<compile_context>
chip_gen: v6e
topology: v6e:2x2x1
jax: 0.10.0
libtpu: 0.0.40
codegen_flags: <defaults>
</compile_context>

<pallas_src>
import functools

import jax
import jax.numpy as jnp
from jax import lax
from jax.experimental import pallas as pl
from jax.experimental.pallas import tpu as pltpu


def _rup(x, m):
    return ((x + m - 1) // m) * m


def _rdown(x, m):
    return (x // m) * m


def _ws_readout_kernel(seq_ref, q_ref, o_ref, m_sc, l_sc, acc_sc, *,
                       n_total, mask_cols):
    # seq_ref: (tb, tn, D)   q_ref: (tb, 1, D)   o_ref: (tb, D)
    # m_sc / l_sc: (tb, 1, 1) f32 scratch   acc_sc: (tb, 1, D) f32 scratch
    ni = pl.program_id(1)
    tb, tn, _ = seq_ref.shape

    @pl.when(ni == 0)
    def _init():
        m_sc[...] = jnp.full_like(m_sc, -jnp.inf)
        l_sc[...] = jnp.zeros_like(l_sc)
        acc_sc[...] = jnp.zeros_like(acc_sc)

    seq = seq_ref[...]                                        # (tb, tn, D)
    q = q_ref[...]                                            # (tb, 1, D)

    if mask_cols:
        # Ragged final N block: zero the padded sequence rows so 0-weight x
        # garbage (possibly inf/NaN padding) cannot produce NaN in the
        # weighted-sum contraction below.
        col_s = lax.broadcasted_iota(jnp.int32, (tb, tn, 1), 1)
        valid_s = (ni * tn + col_s) < n_total                 # (tb, tn, 1)
        seq = jnp.where(valid_s, seq, jnp.array(0, seq.dtype))

    # sim[b, 0, n] = <q[b, 0, :], seq[b, n, :]>  -- MXU, f32 acc, lane-dense on N.
    sim = jnp.einsum('bqd,bnd->bqn', q, seq,
                     preferred_element_type=jnp.float32)      # (tb, 1, tn)

    if mask_cols:
        col_l = lax.broadcasted_iota(jnp.int32, (tb, 1, tn), 2)
        sim = jnp.where((ni * tn + col_l) < n_total, sim, -jnp.inf)

    # Online-softmax update (flash-attention style) over the sequence axis.
    m_prev = m_sc[...]                                        # (tb, 1, 1)
    m_new = jnp.maximum(m_prev, jnp.max(sim, axis=-1, keepdims=True))
    alpha = jnp.exp(m_prev - m_new)                           # (tb, 1, 1)
    p = jnp.exp(sim - m_new)                                  # (tb, 1, tn)
    l_sc[...] = alpha * l_sc[...] + jnp.sum(p, axis=-1, keepdims=True)
    # Unnormalized weighted sum: (tb,1,tn) x (tb,tn,D) -> (tb,1,D), MXU, f32 acc.
    acc_sc[...] = alpha * acc_sc[...] + jnp.einsum(
        'bqn,bnd->bqd', p.astype(seq.dtype), seq,
        preferred_element_type=jnp.float32)
    m_sc[...] = m_new

    @pl.when(ni == pl.num_programs(1) - 1)
    def _finalize():
        # Normalize AFTER the contraction (D multiplies instead of N).
        out = acc_sc[...] * pl.reciprocal(l_sc[...], approx=False)   # (tb, 1, D)
        o_ref[...] = out[:, 0, :].astype(o_ref.dtype)                # (tb, D)


def _choose_tiles(B, N, D, itemsize, block_budget, min_b_steps=4):
    """Pick (tb, tn) = batch rows / sequence rows of `seq` per grid block.

    Legality ((8,128) rule on the last two dims of every block):
      * out block (tb, D): tb % 8 == 0 or tb == B
      * seq block (tb, tn, D): tn % 8 == 0 or tn == N
    The seq block is kept within `block_budget` (never inflated past it).
    """
    slab = N * D * itemsize            # one batch row of seq
    row = max(1, D * itemsize)         # one sequence row

    if slab <= block_budget:
        tb_fit = block_budget // slab
        # Keep >= min_b_steps batch-grid steps (v7x megacore + DMA/compute
        # overlap), but never below the minimum legal batch tile of 8 rows.
        tb_cap = max(8, _rdown(pl.cdiv(B, min_b_steps), 8))
        tb = min(tb_fit, tb_cap, B)
        if tb == B:
            return B, N
        tb = _rdown(tb, 8)
        if tb >= 8:
            return tb, N
        # Fewer than 8 batch slabs fit: tile the sequence axis instead of
        # inflating the block past the budget (the old max(8, ...) bug).

    tb = B if B < 8 else 8
    tn = _rdown(block_budget // (tb * row), 8)
    tn = min(max(8, tn), N)
    # TODO(synk): if even a (8, 8, D) tile exceeds VMEM (huge D), a D grid axis
    # with partial dot-products would be needed.
    return tb, tn


def _block_vmem_bytes(tb, tn, D, itemsize):
    """Rough VMEM residency of one grid step: double-buffered seq/query/out
    blocks plus the f32 online-softmax scratch, including (8,128) padding."""
    sub = 8 * max(1, 4 // itemsize)                 # sublane tile (dtype packing)
    ld = _rup(D, 128)
    seq_blk = tb * _rup(tn, sub) * ld * itemsize    # (tb, tn, D)
    q_blk = tb * sub * ld * itemsize                # (tb, 1, D): 1 pads to sublane tile
    o_blk = _rup(tb, sub) * ld * itemsize           # (tb, D)
    scr = tb * 8 * (2 * 128 + ld) * 4               # (tb,1,1) x2 + (tb,1,D), f32
    return 2 * (seq_blk + q_blk + o_blk) + scr


def ws_readout(seq, query, *, block_budget_bytes=None, min_b_steps=4):
    """seq: (B, N, D), query: (B, 1, D) -> (B, D) softmax-weighted sum over N."""
    B, N, D = seq.shape
    assert query.shape == (B, 1, D), query.shape
    itemsize = jnp.dtype(seq.dtype).itemsize

    # Per-generation VMEM capacity (v5e/v6e: 128 MiB, v7x: 64 MiB per core).
    try:
        vmem_cap = int(pltpu.get_tpu_info().vmem_capacity_bytes)
    except Exception:
        vmem_cap = 64 * 1024 * 1024    # smallest (v7x) as a conservative default

    if block_budget_bytes is None:
        # seq block ~1/6 of physical VMEM: double-buffered seq + query/out +
        # scratch stays around half of VMEM on every generation.
        block_budget_bytes = max(vmem_cap // 6, 1 << 20)

    tb, tn = _choose_tiles(B, N, D, itemsize, block_budget_bytes, min_b_steps)

    # Safety net: if the padded footprint (dominated by (tb,1,D) buffers when N
    # is tiny) still exceeds ~70% of VMEM, shrink the tiles instead of OOMing.
    usable = int(0.70 * vmem_cap)
    while _block_vmem_bytes(tb, tn, D, itemsize) > usable:
        if tb >= 16:
            tb = _rdown(tb // 2, 8)
        elif tn >= 16:
            tn = max(8, _rdown(tn // 2, 8))
        else:
            break                      # already at the minimum legal tile

    grid = (pl.cdiv(B, tb), pl.cdiv(N, tn))
    mask_cols = (tn < N) and (N % tn != 0)
    kernel = functools.partial(_ws_readout_kernel, n_total=N, mask_cols=mask_cols)

    footprint = _block_vmem_bytes(tb, tn, D, itemsize)
    vmem_limit = min(int(0.9 * vmem_cap), max(footprint + (4 << 20), 32 << 20))

    cost = pl.CostEstimate(
        flops=4 * B * N * D,                        # two (N x D) contractions / row
        transcendentals=B * N,                      # softmax exp
        bytes_accessed=(B * N * D + 2 * B * D) * itemsize,
    )

    return pl.pallas_call(
        kernel,
        out_shape=jax.ShapeDtypeStruct((B, D), seq.dtype),
        grid_spec=pltpu.PrefetchScalarGridSpec(
            num_scalar_prefetch=0,
            grid=grid,
            in_specs=[
                # TODO(synk): sweep pipeline_mode=pl.Buffered(3) on this spec once
                # production shapes are fixed (low single-digit % on v7x at best).
                pl.BlockSpec((tb, tn, D), lambda b, n: (b, n, 0)),
                pl.BlockSpec((tb, 1, D), lambda b, n: (b, 0, 0)),
            ],
            out_specs=pl.BlockSpec((tb, D), lambda b, n: (b, 0)),
            scratch_shapes=[
                pltpu.VMEM((tb, 1, 1), jnp.float32),   # running max
                pltpu.VMEM((tb, 1, 1), jnp.float32),   # running denominator
                pltpu.VMEM((tb, 1, D), jnp.float32),   # running weighted sum
            ],
        ),
        compiler_params=pltpu.CompilerParams(
            dimension_semantics=("parallel", "arbitrary"),
            vmem_limit_bytes=vmem_limit,
        ),
        cost_estimate=cost,
    )(seq, query)


def ws_readout_ref(seq, query):
    # Pure-JAX reference mirroring the PyTorch forward.
    qT = jnp.transpose(query, (0, 2, 1))            # (B, D, 1)
    sim = jnp.matmul(seq, qT)                       # (B, N, 1)
    sim = jax.nn.softmax(sim, axis=1)               # (B, N, 1)
    return jnp.sum(seq * sim, axis=1)               # (B, D)


if __name__ == "__main__":
    # WSReadout(embedding_dim=D) has no learnable parameters.
    B, N, D = 2, 8, 32  # batch, sequence length, embedding_dim
    key = jax.random.PRNGKey(0)
    k1, k2, k3, k4, k5, k6 = jax.random.split(key, 6)

    seq = jax.random.normal(k1, (B, N, D), dtype=jnp.float32)
    query = jax.random.normal(k2, (B, 1, D), dtype=jnp.float32)
    out = jax.block_until_ready(ws_readout(seq, query))
    ref = ws_readout_ref(seq, query)
    assert out.shape == (B, D)
    assert jnp.allclose(out, ref, atol=1e-5, rtol=1e-5), "mismatch vs reference"

    # Ragged batch axis (B=20, tb=8 -> grid=(3,1), last block partial): exercises
    # the masked boundary-block write path with NO HBM padding copy of seq.
    B2, N2, D2 = 20, 16, 128
    seq2 = jax.random.normal(k3, (B2, N2, D2), dtype=jnp.float32)
    query2 = jax.random.normal(k4, (B2, 1, D2), dtype=jnp.float32)
    out2 = jax.block_until_ready(ws_readout(seq2, query2))
    assert out2.shape == (B2, D2)
    assert jnp.allclose(out2, ws_readout_ref(seq2, query2),
                        atol=1e-5, rtol=1e-5), "mismatch (ragged batch)"

    # Sequence-tiled online-softmax path: a tiny block budget forces tn=8 < N=36
    # with a ragged final N block (lane masking) plus a ragged batch axis.
    B3, N3, D3 = 10, 36, 128
    seq3 = jax.random.normal(k5, (B3, N3, D3), dtype=jnp.float32)
    query3 = jax.random.normal(k6, (B3, 1, D3), dtype=jnp.float32)
    out3 = jax.block_until_ready(
        ws_readout(seq3, query3, block_budget_bytes=8 * 8 * D3 * 4))
    assert out3.shape == (B3, D3)
    assert jnp.allclose(out3, ws_readout_ref(seq3, query3),
                        atol=3e-5, rtol=3e-5), "mismatch (online softmax)"

    print("KERNEL_OK")
</pallas_src>

<mosaic_0001>
module attributes {stable_mosaic.version = 11 : i64} {
  func.func @_ws_readout_kernel(%arg0: i32, %arg1: i32, %arg2: memref<2x8x32xf32, #tpu.memory_space<vmem>>, %arg3: memref<2x1x32xf32, #tpu.memory_space<vmem>>, %arg4: memref<2x32xf32, #tpu.memory_space<vmem>>, %arg5: memref<2x1x1xf32, #tpu.memory_space<vmem>>, %arg6: memref<2x1x1xf32, #tpu.memory_space<vmem>>, %arg7: memref<2x1x32xf32, #tpu.memory_space<vmem>>) attributes {dimension_semantics = [#tpu.dimension_semantics<parallel>, #tpu.dimension_semantics<arbitrary>], iteration_bounds = array<i64: 1, 1>, scalar_prefetch = 0 : i64, scratch_operands = 3 : i64, tpu.core_type = #tpu.core_type<tc>, window_params = [{transform_indices = @transform_0, window_bounds = array<i64: 2, 8, 32>}, {transform_indices = @transform_1, window_bounds = array<i64: 2, 1, 32>}, {transform_indices = @transform_2, window_bounds = array<i64: 2, 32>}]} {
    %c0_i32 = arith.constant 0 : i32
    %0 = arith.cmpi eq, %arg1, %c0_i32 : i32
    %1 = arith.extui %0 : i1 to i32
    %c0_i32_0 = arith.constant 0 : i32
    %2 = arith.cmpi ne, %1, %c0_i32_0 : i32
    scf.if %2 {
      %cst_29 = arith.constant 0xFF800000 : f32
      %31 = vector.broadcast %cst_29 : f32 to vector<2x1x1xf32>
      %c0_30 = arith.constant 0 : index
      %c0_31 = arith.constant 0 : index
      %c0_32 = arith.constant 0 : index
      %32 = vector.load %arg5[%c0_30, %c0_31, %c0_32] : memref<2x1x1xf32, #tpu.memory_space<vmem>>, vector<2x1x1xf32>
      tpu.vector_store %arg5[%c0_30, %c0_31, %c0_32], %31 {strides = array<i32>} : memref<2x1x1xf32, #tpu.memory_space<vmem>>, vector<2x1x1xf32>,
      %cst_33 = arith.constant 0.000000e+00 : f32
      %33 = vector.broadcast %cst_33 : f32 to vector<2x1x1xf32>
      %c0_34 = arith.constant 0 : index
      %c0_35 = arith.constant 0 : index
      %c0_36 = arith.constant 0 : index
      %34 = vector.load %arg6[%c0_34, %c0_35, %c0_36] : memref<2x1x1xf32, #tpu.memory_space<vmem>>, vector<2x1x1xf32>
      tpu.vector_store %arg6[%c0_34, %c0_35, %c0_36], %33 {strides = array<i32>} : memref<2x1x1xf32, #tpu.memory_space<vmem>>, vector<2x1x1xf32>,
      %cst_37 = arith.constant 0.000000e+00 : f32
      %35 = vector.broadcast %cst_37 : f32 to vector<2x1x32xf32>
      %c0_38 = arith.constant 0 : index
      %c0_39 = arith.constant 0 : index
      %c0_40 = arith.constant 0 : index
      %36 = vector.load %arg7[%c0_38, %c0_39, %c0_40] : memref<2x1x32xf32, #tpu.memory_space<vmem>>, vector<2x1x32xf32>
      tpu.vector_store %arg7[%c0_38, %c0_39, %c0_40], %35 {strides = array<i32>} : memref<2x1x32xf32, #tpu.memory_space<vmem>>, vector<2x1x32xf32>,
    } else {
    }
    %c0 = arith.constant 0 : index
    %c0_1 = arith.constant 0 : index
    %c0_2 = arith.constant 0 : index
    %3 = vector.load %arg2[%c0, %c0_1, %c0_2] : memref<2x8x32xf32, #tpu.memory_space<vmem>>, vector<2x8x32xf32>
    %c0_3 = arith.constant 0 : index
    %c0_4 = arith.constant 0 : index
    %c0_5 = arith.constant 0 : index
    %4 = vector.load %arg3[%c0_3, %c0_4, %c0_5] : memref<2x1x32xf32, #tpu.memory_space<vmem>>, vector<2x1x32xf32>
    "tpu.trace_start"() <{level = 10 : i32, message = "bqd,bnd->bqn"}> : () -> ()
    %cst = arith.constant dense<0.000000e+00> : vector<2x1x8xf32>
    %5 = tpu.matmul %4, %3, %cst {dimension_numbers = #tpu.dot_dimension_numbers<[2], [2], [1], [1], [0, 0, 0, 1, 1, 1], [0], [0]>} : vector<2x1x32xf32>, vector<2x8x32xf32>, vector<2x1x8xf32> -> vector<2x1x8xf32>
    "tpu.trace_stop"() : () -> ()
    %c0_6 = arith.constant 0 : index
    %c0_7 = arith.constant 0 : index
    %c0_8 = arith.constant 0 : index
    %6 = vector.load %arg5[%c0_6, %c0_7, %c0_8] : memref<2x1x1xf32, #tpu.memory_space<vmem>>, vector<2x1x1xf32>
    %cst_9 = arith.constant dense<0xFF800000> : vector<2x1xf32>
    %7 = vector.multi_reduction <maximumf>, %5, %cst_9 [2] : vector<2x1x8xf32> to vector<2x1xf32>
    %8 = vector.shape_cast %7 : vector<2x1xf32> to vector<2x1x1xf32>
    %9 = arith.maximumf %6, %8 : vector<2x1x1xf32>
    %10 = arith.subf %6, %9 : vector<2x1x1xf32>
    %11 = math.exp %10 : vector<2x1x1xf32>
    %12 = vector.broadcast %9 : vector<2x1x1xf32> to vector<2x1x8xf32>
    %13 = arith.subf %5, %12 : vector<2x1x8xf32>
    %14 = math.exp %13 : vector<2x1x8xf32>
    %c0_10 = arith.constant 0 : index
    %c0_11 = arith.constant 0 : index
    %c0_12 = arith.constant 0 : index
    %15 = vector.load %arg6[%c0_10, %c0_11, %c0_12] : memref<2x1x1xf32, #tpu.memory_space<vmem>>, vector<2x1x1xf32>
    %16 = arith.mulf %11, %15 : vector<2x1x1xf32>
    %cst_13 = arith.constant dense<0.000000e+00> : vector<2x1xf32>
    %17 = vector.multi_reduction <add>, %14, %cst_13 [2] : vector<2x1x8xf32> to vector<2x1xf32>
    %18 = vector.shape_cast %17 : vector<2x1xf32> to vector<2x1x1xf32>
    %19 = arith.addf %16, %18 : vector<2x1x1xf32>
    %c0_14 = arith.constant 0 : index
    %c0_15 = arith.constant 0 : index
    %c0_16 = arith.constant 0 : index
    %20 = vector.load %arg6[%c0_14, %c0_15, %c0_16] : memref<2x1x1xf32, #tpu.memory_space<vmem>>, vector<2x1x1xf32>
    tpu.vector_store %arg6[%c0_14, %c0_15, %c0_16], %19 {strides = array<i32>} : memref<2x1x1xf32, #tpu.memory_space<vmem>>, vector<2x1x1xf32>,
    %c0_17 = arith.constant 0 : index
    %c0_18 = arith.constant 0 : index
    %c0_19 = arith.constant 0 : index
    %21 = vector.load %arg7[%c0_17, %c0_18, %c0_19] : memref<2x1x32xf32, #tpu.memory_space<vmem>>, vector<2x1x32xf32>
    %22 = vector.broadcast %11 : vector<2x1x1xf32> to vector<2x1x32xf32>
    %23 = arith.mulf %22, %21 : vector<2x1x32xf32>
    "tpu.trace_start"() <{level = 10 : i32, message = "bqn,bnd->bqd"}> : () -> ()
    %cst_20 = arith.constant dense<0.000000e+00> : vector<2x1x32xf32>
    %24 = tpu.matmul %14, %3, %cst_20 {dimension_numbers = #tpu.dot_dimension_numbers<[2], [1], [1], [2], [0, 0, 0, 1, 1, 2], [0], [0]>} : vector<2x1x8xf32>, vector<2x8x32xf32>, vector<2x1x32xf32> -> vector<2x1x32xf32>
    "tpu.trace_stop"() : () -> ()
    %25 = arith.addf %23, %24 : vector<2x1x32xf32>
    %c0_21 = arith.constant 0 : index
    %c0_22 = arith.constant 0 : index
    %c0_23 = arith.constant 0 : index
    %26 = vector.load %arg7[%c0_21, %c0_22, %c0_23] : memref<2x1x32xf32, #tpu.memory_space<vmem>>, vector<2x1x32xf32>
    tpu.vector_store %arg7[%c0_21, %c0_22, %c0_23], %25 {strides = array<i32>} : memref<2x1x32xf32, #tpu.memory_space<vmem>>, vector<2x1x32xf32>,
    %c0_24 = arith.constant 0 : index
    %c0_25 = arith.constant 0 : index
    %c0_26 = arith.constant 0 : index
    %27 = vector.load %arg5[%c0_24, %c0_25, %c0_26] : memref<2x1x1xf32, #tpu.memory_space<vmem>>, vector<2x1x1xf32>
    tpu.vector_store %arg5[%c0_24, %c0_25, %c0_26], %9 {strides = array<i32>} : memref<2x1x1xf32, #tpu.memory_space<vmem>>, vector<2x1x1xf32>,
    %c0_i32_27 = arith.constant 0 : i32
    %28 = arith.cmpi eq, %arg1, %c0_i32_27 : i32
    %29 = arith.extui %28 : i1 to i32
    %c0_i32_28 = arith.constant 0 : i32
    %30 = arith.cmpi ne, %29, %c0_i32_28 : i32
    scf.if %30 {
      %c0_29 = arith.constant 0 : index
      %c0_30 = arith.constant 0 : index
      %c0_31 = arith.constant 0 : index
      %31 = vector.load %arg7[%c0_29, %c0_30, %c0_31] : memref<2x1x32xf32, #tpu.memory_space<vmem>>, vector<2x1x32xf32>
      %c0_32 = arith.constant 0 : index
      %c0_33 = arith.constant 0 : index
      %c0_34 = arith.constant 0 : index
      %32 = vector.load %arg6[%c0_32, %c0_33, %c0_34] : memref<2x1x1xf32, #tpu.memory_space<vmem>>, vector<2x1x1xf32>
      %33 = tpu.reciprocal %32 : vector<2x1x1xf32> -> vector<2x1x1xf32>
      %34 = vector.broadcast %33 : vector<2x1x1xf32> to vector<2x1x32xf32>
      %35 = arith.mulf %31, %34 : vector<2x1x32xf32>
      %36 = vector.shape_cast %35 : vector<2x1x32xf32> to vector<2x32xf32>
      %c0_35 = arith.constant 0 : index
      %c0_36 = arith.constant 0 : index
      %37 = vector.load %arg4[%c0_35, %c0_36] : memref<2x32xf32, #tpu.memory_space<vmem>>, vector<2x32xf32>
      tpu.vector_store %arg4[%c0_35, %c0_36], %36 {strides = array<i32>} : memref<2x32xf32, #tpu.memory_space<vmem>>, vector<2x32xf32>,
    } else {
    }
    return
  }
  func.func @transform_0(%arg0: i32, %arg1: i32) -> (i32, i32, i32) {
    %c0_i32 = arith.constant 0 : i32
    %c0_i32_0 = arith.constant 0 : i32
    return %arg0, %arg1, %c0_i32 : i32, i32, i32
  }
  func.func @transform_1(%arg0: i32, %arg1: i32) -> (i32, i32, i32) {
    %c0_i32 = arith.constant 0 : i32
    %c0_i32_0 = arith.constant 0 : i32
    %c0_i32_1 = arith.constant 0 : i32
    return %arg0, %c0_i32, %c0_i32_0 : i32, i32, i32
  }
  func.func @transform_2(%arg0: i32, %arg1: i32) -> (i32, i32) {
    %c0_i32 = arith.constant 0 : i32
    %c0_i32_0 = arith.constant 0 : i32
    return %arg0, %c0_i32 : i32, i32
  }
}

</mosaic_0001>

<bundles_post_ra>
// kernel: tpu_custom_call.1
= control target key start
LH: loop header
LB: loop body
LE: loop exit
PB: predicated region body
PF: predicated region fallthrough
CT: control target
= control target key end

     0   :  { %7 = vsyncpa [#allocation6], 0  ;;  %s712_s0 = inlined_call_operand.hbm [shape: f32[2,8,32], index: 0, kind: input, shape index: {}]   ;;  %s713_s1 = inlined_call_operand.hbm [shape: f32[2,1,32], index: 1, kind: input, shape index: {}]   ;;  %s714_s2 = inlined_call_operand.hbm [shape: f32[2,32], index: 2, kind: output, shape index: {}]  }
   0x1   :  { %8 = vsyncpa [#allocation9], 0 }
   0x2   :  { %9 = vsyncpa [#allocation7], 0  ;;  %s632_s9 = smov [#allocation5]  }
   0x3   :  { %s15_s10 = sshll.u32 %s632_s9, 4  ;;  %s16_s10 = int_to_ptr.vmem [resolvable:$true] %s15_s10 }
   0x4   :  { %s574_s11 = scalar_lea.vmem %s16_s10, 256  ;;  %p579_p1 = scmp.lt.s32.totalorder %s16_s10, %s16_s10 }
   0x5   :  { %p575_p0 = scmp.ne.s32.totalorder %s16_s10, %s574_s11  ;;  %p580_p2 = scmp.lt.s32.totalorder %s574_s11, %s574_s11 }
   0x7   :  { %p581_p3 = por %p580_p2, %p579_p1 }
   0x9   :  { %p582_p4 = pnand %p581_p3, %p575_p0 }
   0xb   :  { %585 = shalt.err (!%p582_p4)
}
   0xc   :  { %s633_s12 = smov 128   ;;  %s634_s13 = smov 8  }
   0xd   :  { %21 = dma.hbm_to_vmem [thread:$0]  %s712_s0, 256, %s16_s10, [#allocation6], %s633_s12, %s633_s12, %s634_s13  }
   0xe   :  { %s635_s16 = smov [#allocation8]  }
   0xf   :  { %s27_s17 = sshll.u32 %s635_s16, 4  ;;  %s28_s17 = int_to_ptr.vmem [resolvable:$true] %s27_s17 }
  0x10   :  { %s594_s18 = scalar_lea.vmem %s28_s17, 32  ;;  %p599_p6 = scmp.lt.s32.totalorder %s28_s17, %s28_s17 }
  0x11   :  { %p595_p5 = scmp.ne.s32.totalorder %s28_s17, %s594_s18  ;;  %p600_p7 = scmp.lt.s32.totalorder %s594_s18, %s594_s18 }
  0x13   :  { %p601_p8 = por %p600_p7, %p599_p6 }
  0x15   :  { %p602_p9 = pnand %p601_p8, %p595_p5 }
  0x17   :  { %605 = shalt.err (!%p602_p9)
}
  0x18   :  { %s636_s19 = smov 16   ;;  %s637_s20 = smov 1  }
  0x19   :  { %33 = dma.hbm_to_vmem [thread:$0]  %s713_s1, 32, %s28_s17, [#allocation9], %s636_s19, %s636_s19, %s637_s20  }
  0x1a   :  { %626 = dma.done.wait [#allocation6], 256  }
  0x1b   :  { %627 = vsyncadd [#allocation6], 4294967040 }
  0x1c   :  { %628 = dma.done.wait [#allocation9], 32  }
  0x1d   :  { %629 = vsyncadd [#allocation9], 4294967264  ;;  %v638_v0 = vmov 0.0   ;;  %vm639_vm0 = vmmov 0   ;;  %vm56_vm1 = vcmask 261120   ;;  %v52_v1 = vld [vmem:[#allocation5] sm:$0xff]  ;;  %v231_v21 = vlaneseq }
  0x1e   :  { %520 = vmatprep.subr.mxu0 %v638_v0  ;;  %525 = vmatprep.subr.mxu1 %v638_v0  ;;  %v53_v2 = vld [vmem:[#allocation5 + $0x8] sm:$0xff]  ;;  %v54_v3 = vld [vmem:[#allocation8] sm:$0x1]  ;;  %v55_v4 = vld [vmem:[#allocation8 + $0x1] sm:$0x1]  ;;  %vm44_vm2 = vcmask 0  }
  0x1f   :  { %522 = vmatprep.mubr.msk.f32.mxu0 %vm639_vm0, %v638_v0  ;;  %527 = vmatprep.mubr.msk.f32.mxu1 %vm639_vm0, %v638_v0  ;;  %v640_v5 = vmov -inf   ;;  %47 = vst.msk [vmem:[#allocation3] sm:$0x1] %vm44_vm2, %v638_v0  ;;  %48 = vst.msk [vmem:[#allocation3 + $0x1] sm:$0x1] %vm44_vm2, %v638_v0  ;;  %vm211_vm3 = vcmask 57344  }
  0x20   :  { %521 = vmatpush3.xpose.msk.msra.mxu0 %vm56_vm1, %v52_v1  ;;  %526 = vmatpush3.xpose.msk.msra.mxu1 %vm56_vm1, %v53_v2  ;;  %45 = vst.msk [vmem:[#allocation2] sm:$0x1] %vm44_vm2, %v640_v5  ;;  %46 = vst.msk [vmem:[#allocation2 + $0x1] sm:$0x1] %vm44_vm2, %v640_v5  ;;  %v641_v12 = vmov 0   ;;  %v687_v22 = vshrl.u32 %v231_v21, 7 }
  0x21   :  { %530 = vmatprep.subr.mxu0 %v638_v0  ;;  %535 = vmatprep.subr.mxu1 %v638_v0  ;;  %vm287_vm4 = vcmask 64512   ;;  %vm49_vm5 = vcmask 253952   ;;  %s643_s0 = smov [#allocation10]   ;;  %vm488_vm6 = vcmask 254976  }
  0x22   :  { %552 = vset.pattern.permute.xlu1 %v641_v12  ;;  %553 = vset.pattern.permute.xlu0 %v641_v12  ;;  %v690_v23 = vsub.s32 0, %v687_v22  ;;  %50 = vst.msk [vmem:[#allocation4] sm:$0x1] %vm49_vm5, %v638_v0  ;;  %51 = vst.msk [vmem:[#allocation4 + $0x1] sm:$0x1] %vm49_vm5, %v638_v0  ;;  %s496_s1 = sshll.u32 %s643_s0, 4  ;;  %s497_s1 = int_to_ptr.vmem [resolvable:$true] %s496_s1 }
  0x23   :  { %523 = vmatmul.mubr.msk.f32.vlgmr.msra.gmra.mxu0 %vm56_vm1, %v54_v3  ;;  %528 = vmatmul.mubr.msk.f32.vlgmr.msra.gmra.mxu1 %vm56_vm1, %v55_v4  ;;  %s606_s23 = scalar_lea.vmem %s497_s1, 32  ;;  %p611_p11 = scmp.lt.s32.totalorder %s497_s1, %s497_s1 }
  0x24   :  { %531 = vmatpush3.msra.mxu0 %v52_v1  ;;  %532 = vmatprep.mubr.msk.f32.mxu0 %vm639_vm0, %v638_v0  ;;  %p607_p10 = scmp.ne.s32.totalorder %s497_s1, %s606_s23  ;;  %p612_p12 = scmp.lt.s32.totalorder %s606_s23, %s606_s23 }
  0x25   :  { %536 = vmatpush3.msra.mxu1 %v53_v2  ;;  %537 = vmatprep.mubr.msk.f32.mxu1 %vm639_vm0, %v638_v0  ;;  %v642_v2 = vmov 1966171168  }
  0x26   :  { %v250_v40 = vld [vmem:[#allocation3] sm:$0x1]  ;;  %v251_v43 = vld [vmem:[#allocation3 + $0x1] sm:$0x1]  ;;  %v474_v3 = vunpack.c.l.s4 %v642_v2  ;;  %p613_p13 = por %p612_p12, %p611_p11 }
  0x27   :  { %v209_v13 = vld [vmem:[#allocation2] sm:$0x1]  ;;  %v210_v16 = vld [vmem:[#allocation2 + $0x1] sm:$0x1] }
  0x28   :  { %p614_p0 = pnand %p613_p13, %p607_p10 }
  0x29   :  { %v265_v55 = vld [vmem:[#allocation4] sm:$0x1]  ;;  %v266_v59 = vld [vmem:[#allocation4 + $0x1] sm:$0x1] }
  0xe3   :  { %v129_v6 = vpop.f32.mrf.mxu0  ;;  %v205_v7 = vpop.f32.mrf.mxu1 }
  0xe4   :  { %v212_v8 = vsel %vm211_vm3, %v129_v6, -inf  ;;  %v215_v11 = vsel %vm211_vm3, %v205_v7, -inf }
  0xe5   :  { %213 = vmax.xlane.f32.xlu0 %v212_v8  ;;  %v524_v9 = vpop.f32.mrf.mxu0  ;;  %v529_v10 = vpop.f32.mrf.mxu1 }
  0xe9   :  { %216 = vmax.xlane.f32.xlu0 %v215_v11 }
 0x16e   :  { %v214_v14 = vpop.xlane.xlu0 %213 }
 0x16f   :  { %v218_v15 = vmax.f32 %v209_v13, %v214_v14 }
 0x171   :  { %v220_v17 = vsub.f32 %v209_v13, %v218_v15  ;;  %439 = vst.msk [vmem:[#allocation2] sm:$0x1] %vm44_vm2, %v218_v15  ;;  %228 = vperm.xlu1 %552, %v218_v15  }
 0x172   :  { %v217_v18 = vpop.xlane.xlu0 %216 }
 0x173   :  { %v219_v19 = vmax.f32 %v210_v16, %v217_v18  ;;  %v222_v37 = vmul.f32 1.442695, %v220_v17 }
 0x175   :  { %v221_v20 = vsub.f32 %v210_v16, %v219_v19  ;;  %440 = vst.msk [vmem:[#allocation2 + $0x1] sm:$0x1] %vm44_vm2, %v219_v19  ;;  %237 = vperm.xlu1 %552, %v219_v19  }
 0x177   :  { %v224_v35 = vmul.f32 1.442695, %v221_v20 }
 0x1ec   :  { %v229_v24 = vpop.permute.xlu1 %228 }
 0x1ed   :  { %v234_v25 = vrot.slane %v229_v24, %v690_v23 }
 0x1ef   :  { %v244_v26 = vsub.f32 %v129_v6, %v234_v25  ;;  %v475_v6 = vunpack.c.0.s8 %v474_v3 }
 0x1f0   :  { %v238_v27 = vpop.permute.xlu1 %237 }
 0x1f1   :  { %v246_v28 = vmul.f32 1.442695, %v244_v26  ;;  %v243_v29 = vrot.slane %v238_v27, %v690_v23  ;;  %v478_v12 = vsub.s32 %v475_v6, %v687_v22 }
 0x1f3   :  { %554 = vpow2.f32 %v246_v28  ;;  %v245_v30 = vsub.f32 %v205_v7, %v243_v29 }
 0x1f5   :  { %v248_v31 = vmul.f32 1.442695, %v245_v30 }
 0x1f7   :  { %556 = vpow2.f32 %v248_v31 }
 0x1f8   :  { %558 = vpow2.f32 %v224_v35 }
 0x1f9   :  { %560 = vpow2.f32 %v222_v37 }
 0x200   :  { %v555_v32 = vpop.eup %554 }
 0x201   :  { %533 = vmatmul.mubr.msk.f32.vlgmr.msra.gmra.mxu0 %vm287_vm4, %v555_v32  ;;  %v254_v33 = vsel %vm211_vm3, %v555_v32, 0.0 }
 0x202   :  { %255 = vadd.xlane.f32.xlu0 %v254_v33 }
 0x204   :  { %v557_v34 = vpop.eup %556 }
 0x205   :  { %538 = vmatmul.mubr.msk.f32.vlgmr.msra.gmra.mxu1 %vm287_vm4, %v557_v34  ;;  %v257_v36 = vsel %vm211_vm3, %v557_v34, 0.0  ;;  %v559_v38 = vpop.eup %558 }
 0x206   :  { %258 = vadd.xlane.f32.xlu1 %v257_v36  ;;  %v561_v39 = vpop.eup %560  ;;  %v253_v45 = vmul.f32 %v559_v38, %v251_v43 }
 0x207   :  { %v252_v41 = vmul.f32 %v561_v39, %v250_v40 }
 0x217   :  { %278 = vperm.xlu1 %552, %v559_v38  }
 0x218   :  { %269 = vperm.xlu0 %553, %v561_v39  }
 0x28b   :  { %v256_v42 = vpop.xlane.xlu0 %255 }
 0x28c   :  { %v260_v44 = vadd.f32 %v256_v42, %v252_v41 }
 0x28e   :  { %263 = vst.msk [vmem:[#allocation3] sm:$0x1] %vm44_vm2, %v260_v44 }
 0x28f   :  { %v259_v46 = vpop.xlane.xlu1 %258 }
 0x290   :  { %v261_v47 = vadd.f32 %v259_v46, %v253_v45 }
 0x292   :  { %264 = vst.msk [vmem:[#allocation3 + $0x1] sm:$0x1] %vm44_vm2, %v261_v47 }
 0x293   :  { %v270_v52 = vpop.permute.xlu0 %269  ;;  %v279_v54 = vpop.permute.xlu1 %278 }
 0x294   :  { %v275_v53 = vrot.slane %v270_v52, %v690_v23  ;;  %v284_v56 = vrot.slane %v279_v54, %v690_v23 }
 0x295   :  { %v446_v48 = vld [vmem:[#allocation3] sm:$0x1] }
 0x296   :  { %562 = vrcp.f32 %v446_v48  ;;  %v285_v57 = vmul.f32 %v275_v53, %v265_v55  ;;  %v286_v62 = vmul.f32 %v284_v56, %v266_v59 }
 0x299   :  { %v447_v49 = vld [vmem:[#allocation3 + $0x1] sm:$0x1] }
 0x29a   :  { %564 = vrcp.f32 %v447_v49 }
 0x2a3   :  { %v563_v50 = vpop.eup %562 }
 0x2a4   :  { %452 = vperm.xlu0 %553, %v563_v50  }
 0x2a7   :  { %v565_v51 = vpop.eup %564 }
 0x2a8   :  { %461 = vperm.xlu0 %553, %v565_v51  }
 0x2c1   :  { %v357_v58 = vpop.f32.mrf.mxu0 }
 0x2c2   :  { %v434_v60 = vadd.f32 %v357_v58, %v285_v57 }
 0x2c3   :  { %v534_v61 = vpop.f32.mrf.mxu0 }
 0x2c4   :  { %437 = vst.msk [vmem:[#allocation4] sm:$0x1] %vm49_vm5, %v434_v60 }
 0x2c5   :  { %v430_v63 = vpop.f32.mrf.mxu1 }
 0x2c6   :  { %v435_v0 = vadd.f32 %v430_v63, %v286_v62 }
 0x2c7   :  { %v539_v1 = vpop.f32.mrf.mxu1 }
 0x2c8   :  { %438 = vst.msk [vmem:[#allocation4 + $0x1] sm:$0x1] %vm49_vm5, %v435_v0 }
 0x2cb   :  { %v444_v9 = vld [vmem:[#allocation4] sm:$0x1] }
 0x2cf   :  { %v445_v10 = vld [vmem:[#allocation4 + $0x1] sm:$0x1] }
 0x31f   :  { %v453_v4 = vpop.permute.xlu0 %452 }
 0x320   :  { %v458_v5 = vrot.slane %v453_v4, %v690_v23 }
 0x322   :  { %v468_v11 = vmul.f32 %v458_v5, %v444_v9 }
 0x323   :  { %v462_v7 = vpop.permute.xlu0 %461 }
 0x324   :  { %v467_v8 = vrot.slane %v462_v7, %v690_v23 }
 0x326   :  { %v469_v13 = vmul.f32 %v467_v8, %v445_v10 }
 0x328   :  { %v472_v14 = vcombine.low %v468_v11, %v469_v13 }
 0x32a   :  { %v479_v15 = vrot.slane %v472_v14, %v478_v12 }
 0x32c   :  { %v486_v16 = vrot.slane %v479_v15, %v478_v12 }
 0x32e   :  { %489 = vst.msk [vmem:[#allocation10] sm:$0x3] %vm488_vm6, %v486_v16 }
 0x32f   :  { %617 = shalt.err (!%p614_p0)
}
 0x330   :  { %499 = dma.vmem_to_hbm [thread:$0]  %s497_s1, 32, %s714_s2, [#allocation7]  }
 0x331   :  { %630 = dma.done.wait [#allocation7], 32  }
 0x332   :  { %631 = vsyncadd [#allocation7], 4294967264 }
 0x333   :  { %503 = vsyncpa [#allocation6], 1 }
 0x334   :  { %504 = vsyncpa [#allocation9], 1 }
 0x335   :  { %505 = vsyncpa [#allocation7], 1 }

</bundles_post_ra>
